<compile_context>
chip_gen: v6e
topology: v6e:2x2x1
jax: 0.10.0
libtpu: 0.0.40
codegen_flags: <defaults>
</compile_context>

<pallas_src>
import functools

import jax
import jax.numpy as jnp
from jax import lax
from jax.experimental import pallas as pl
from jax.experimental.pallas import tpu as pltpu


def dense_layer_kernel(gamma_ref, beta_ref, x_ref, w_ref, out_ref,
                       pad_ref, stack_ref, *, width, eps, n_batch):
    """Whole layer in one step (batch folded into the block).

    gamma_ref: (Cin, 1)  f32            BN affine weight
    beta_ref:  (Cin, 1)  f32            BN affine bias
    x_ref:     (N, Cin, HW) f32         input, spatial dims flattened on lanes
    w_ref:     (Cout, 9*Cin)            conv weights, col = (ky*3+kx)*Cin + c
    out_ref:   (N, Cin+Cout, HW) f32    concatenated [x, new_feat]
    pad_ref:   (N*3*Cin, HW + 2*W + 2)  scratch: row-zero-padded, pre-masked
                                        activation variants (one per kx)
    stack_ref: (9*Cin, N*HW)            scratch: stacked im2col activation
    """
    cin = x_ref.shape[1]
    hw = x_ref.shape[2]
    w = width
    halo = w + 1
    mm_dtype = stack_ref.dtype

    # One HBM read of x feeds the BN statistics, the normalization and the
    # fused concat copy.
    x = x_ref[...]                                     # (N, Cin, HW) f32

    # ---- BatchNorm training-mode batch statistics, computed in-kernel.
    xsum = jnp.zeros((cin, 1), jnp.float32)
    xsq = jnp.zeros((cin, 1), jnp.float32)
    for b in range(n_batch):
        xb = x[b]
        xsum = xsum + jnp.sum(xb, axis=1, keepdims=True)
        xsq = xsq + jnp.sum(xb * xb, axis=1, keepdims=True)
    inv_count = 1.0 / float(n_batch * hw)
    mean = xsum * inv_count
    var = xsq * inv_count - mean * mean                # biased variance (PyTorch fwd)
    scale = gamma_ref[...] * lax.rsqrt(var + eps)      # (Cin, 1)
    bias = beta_ref[...] - mean * scale

    # ---- Column masks from an in-kernel iota (no masks input / DMA).
    col = lax.broadcasted_iota(jnp.int32, (1, hw), 1)
    if (w & (w - 1)) == 0:
        col = jnp.bitwise_and(col, w - 1)              # col index within image row
    else:
        col = col % w
    not_last = (col != (w - 1)).astype(jnp.float32)    # kills the kx==0 column wrap
    not_first = (col != 0).astype(jnp.float32)         # kills the kx==2 column wrap

    # ---- Pre-masked, row-zero-padded activation variants (one per kx).
    pad_ref[...] = jnp.zeros_like(pad_ref)             # zero halos (scratch is tiny)
    for b in range(n_batch):
        a = jnp.maximum(x[b] * scale + bias, 0.0)      # BN + ReLU, f32 on the VPU
        variants = (a * not_last, a, a * not_first)    # kx = 0, 1, 2
        for kx in range(3):
            r0 = (b * 3 + kx) * cin
            pad_ref[r0:r0 + cin, halo:halo + hw] = variants[kx].astype(mm_dtype)

    # ---- Stacked im2col (9*Cin, N*HW): each tap's unaligned slice paid once.
    for b in range(n_batch):
        for ky in range(3):
            for kx in range(3):
                t = ky * 3 + kx
                off = ky * w + kx
                r0 = (b * 3 + kx) * cin
                stack_ref[t * cin:(t + 1) * cin, b * hw:(b + 1) * hw] = (
                    pad_ref[r0:r0 + cin, off:off + hw])

    # ---- Single MXU matmul: (Cout, 9*Cin) @ (9*Cin, N*HW), f32 accumulation.
    nf = jnp.dot(w_ref[...], stack_ref[...], preferred_element_type=jnp.float32)

    # ---- Fused torch.cat([x, new_feat], dim=1): one full-slab store per image.
    for b in range(n_batch):
        nf_b = nf[:, b * hw:(b + 1) * hw]              # (Cout, HW)
        out_ref[b] = jnp.concatenate([x[b], nf_b], axis=0).astype(out_ref.dtype)


@functools.partial(jax.jit, static_argnames=("eps", "matmul_dtype"))
def dense_layer_forward(x_nchw, gamma, beta, conv_w_oihw, *, eps=1e-5,
                        matmul_dtype=jnp.float32):
    """Pallas-backed DenseLayer forward.  x_nchw: (N, Cin, H, W) float32."""
    N, Cin, H, W = x_nchw.shape
    Cout = conv_w_oihw.shape[0]
    HW = H * W
    WPAD = HW + 2 * W + 2

    # TODO(synk): BatchNorm running-stats momentum update (PyTorch training-mode
    # module-state side effect) is not represented; only the forward output is
    # computed (with batch statistics, matching PyTorch training-mode forward).

    # Free (metadata-only) reshapes; the kernel works natively in NCHW with the
    # spatial dims flattened onto the lane axis.
    x_flat = x_nchw.reshape(N, Cin, HW)
    # Lane-dense stacked-weight layout: w2d[o, (ky*3+kx)*Cin + c] = w[o, c, ky, kx].
    w2d = jnp.transpose(conv_w_oihw, (0, 2, 3, 1)).reshape(Cout, 9 * Cin)
    w2d = w2d.astype(matmul_dtype)
    gamma2 = gamma.reshape(Cin, 1).astype(jnp.float32)
    beta2 = beta.reshape(Cin, 1).astype(jnp.float32)

    # NOTE: at production DenseNet shapes (Cin ~ 512-1024, 56x56), add a spatial
    # row-tile grid axis (>=2 "parallel" steps so both v7x TensorCores are used,
    # tiles a multiple of 128 lanes with a 1-row halo) and set vmem_limit_bytes
    # explicitly for v7x's 64 MiB VMEM.  At this size the whole problem (~50 KB)
    # fits one step, which amortizes the per-step grid/DMA overhead.
    kernel = functools.partial(dense_layer_kernel, width=W, eps=eps, n_batch=N)
    out_flat = pl.pallas_call(
        kernel,
        out_shape=jax.ShapeDtypeStruct((N, Cin + Cout, HW), jnp.float32),
        grid=(1,),
        in_specs=[
            pl.BlockSpec((Cin, 1), lambda i: (0, 0)),
            pl.BlockSpec((Cin, 1), lambda i: (0, 0)),
            pl.BlockSpec((N, Cin, HW), lambda i: (0, 0, 0)),
            pl.BlockSpec((Cout, 9 * Cin), lambda i: (0, 0)),
        ],
        out_specs=pl.BlockSpec((N, Cin + Cout, HW), lambda i: (0, 0, 0)),
        scratch_shapes=[
            pltpu.VMEM((N * 3 * Cin, WPAD), matmul_dtype),
            pltpu.VMEM((9 * Cin, N * HW), matmul_dtype),
        ],
        compiler_params=pltpu.CompilerParams(
            dimension_semantics=("arbitrary",)),
    )(gamma2, beta2, x_flat, w2d)

    return out_flat.reshape(N, Cin + Cout, H, W)


def _reference_forward(x, gamma, beta, w, eps=1e-5):
    """Pure-JAX reference of the PyTorch forward (training-mode BN)."""
    mean = jnp.mean(x, axis=(0, 2, 3), keepdims=True)
    var = jnp.var(x, axis=(0, 2, 3), keepdims=True)
    xn = (x - mean) / jnp.sqrt(var + eps)
    xn = xn * gamma.reshape(1, -1, 1, 1) + beta.reshape(1, -1, 1, 1)
    a = jnp.maximum(xn, 0.0)
    new_feat = lax.conv_general_dilated(
        a, w, window_strides=(1, 1), padding=((1, 1), (1, 1)),
        dimension_numbers=("NCHW", "OIHW", "NCHW"))
    return jnp.concatenate([x, new_feat], axis=1)


if __name__ == "__main__":
    # Small shapes consistent with the module: batch=2, in_channels=4, 16x16,
    # growth_rate=8.
    N, Cin, H, W = 2, 4, 16, 16
    growth_rate = 8

    key = jax.random.PRNGKey(0)
    kx, kw, kg, kb = jax.random.split(key, 4)
    x = jax.random.normal(kx, (N, Cin, H, W), dtype=jnp.float32)
    conv_w = jax.random.normal(kw, (growth_rate, Cin, 3, 3), dtype=jnp.float32) * 0.1
    gamma = jnp.ones((Cin,), jnp.float32) + 0.05 * jax.random.normal(kg, (Cin,), dtype=jnp.float32)
    beta = 0.05 * jax.random.normal(kb, (Cin,), dtype=jnp.float32)

    ref = _reference_forward(x, gamma, beta, conv_w)

    # f32 matmul path (strict check; BN stats use an in-kernel single-pass
    # formulation, hence the slightly relaxed 1e-3 tolerance).
    out = jax.block_until_ready(dense_layer_forward(x, gamma, beta, conv_w))
    assert out.shape == (N, Cin + growth_rate, H, W), out.shape
    assert jnp.allclose(out, ref, rtol=1e-3, atol=1e-3), "f32 path mismatch vs reference"

    # bf16 matmul-operand path (f32 accumulation), loose tolerance.
    out_bf16 = jax.block_until_ready(
        dense_layer_forward(x, gamma, beta, conv_w, matmul_dtype=jnp.bfloat16))
    assert out_bf16.shape == (N, Cin + growth_rate, H, W), out_bf16.shape
    assert jnp.allclose(out_bf16, ref, rtol=5e-2, atol=5e-2), "bf16 path mismatch vs reference"

    print("KERNEL_OK")
</pallas_src>

<mosaic_0001>
module attributes {stable_mosaic.version = 11 : i64} {
  func.func @dense_layer_kernel(%arg0: i32, %arg1: memref<4x1xf32, #tpu.memory_space<vmem>>, %arg2: memref<4x1xf32, #tpu.memory_space<vmem>>, %arg3: memref<2x4x256xf32, #tpu.memory_space<vmem>>, %arg4: memref<8x36xf32, #tpu.memory_space<vmem>>, %arg5: memref<2x12x256xf32, #tpu.memory_space<vmem>>, %arg6: memref<24x290xf32, #tpu.memory_space<vmem>>, %arg7: memref<36x512xf32, #tpu.memory_space<vmem>>) attributes {dimension_semantics = [#tpu.dimension_semantics<arbitrary>], iteration_bounds = array<i64: 1>, scalar_prefetch = 0 : i64, scratch_operands = 2 : i64, tpu.core_type = #tpu.core_type<tc>, window_params = [{pipeline_mode = #tpu.pipeline_mode<synchronous>, transform_indices = @transform_0, window_bounds = array<i64: 4, 1>}, {pipeline_mode = #tpu.pipeline_mode<synchronous>, transform_indices = @transform_1, window_bounds = array<i64: 4, 1>}, {pipeline_mode = #tpu.pipeline_mode<synchronous>, transform_indices = @transform_2, window_bounds = array<i64: 2, 4, 256>}, {pipeline_mode = #tpu.pipeline_mode<synchronous>, transform_indices = @transform_3, window_bounds = array<i64: 8, 36>}, {pipeline_mode = #tpu.pipeline_mode<synchronous>, transform_indices = @transform_4, window_bounds = array<i64: 2, 12, 256>}]} {
    %c0 = arith.constant 0 : index
    %c0_0 = arith.constant 0 : index
    %c0_1 = arith.constant 0 : index
    %0 = vector.load %arg3[%c0, %c0_0, %c0_1] : memref<2x4x256xf32, #tpu.memory_space<vmem>>, vector<2x4x256xf32>
    %cst = arith.constant 0.000000e+00 : f32
    %1 = vector.broadcast %cst : f32 to vector<4x1xf32>
    %cst_2 = arith.constant 0.000000e+00 : f32
    %2 = vector.broadcast %cst_2 : f32 to vector<4x1xf32>
    %3 = vector.extract_strided_slice %0 {offsets = [0, 0, 0], sizes = [1, 4, 256], strides = [1, 1, 1]} : vector<2x4x256xf32> to vector<1x4x256xf32>
    %4 = vector.shape_cast %3 : vector<1x4x256xf32> to vector<4x256xf32>
    %cst_3 = arith.constant dense<0.000000e+00> : vector<4xf32>
    %5 = vector.multi_reduction <add>, %4, %cst_3 [1] : vector<4x256xf32> to vector<4xf32>
    %6 = vector.shape_cast %5 : vector<4xf32> to vector<4x1xf32>
    %7 = arith.addf %1, %6 : vector<4x1xf32>
    %8 = arith.mulf %4, %4 : vector<4x256xf32>
    %cst_4 = arith.constant dense<0.000000e+00> : vector<4xf32>
    %9 = vector.multi_reduction <add>, %8, %cst_4 [1] : vector<4x256xf32> to vector<4xf32>
    %10 = vector.shape_cast %9 : vector<4xf32> to vector<4x1xf32>
    %11 = arith.addf %2, %10 : vector<4x1xf32>
    %12 = vector.extract_strided_slice %0 {offsets = [1, 0, 0], sizes = [1, 4, 256], strides = [1, 1, 1]} : vector<2x4x256xf32> to vector<1x4x256xf32>
    %13 = vector.shape_cast %12 : vector<1x4x256xf32> to vector<4x256xf32>
    %cst_5 = arith.constant dense<0.000000e+00> : vector<4xf32>
    %14 = vector.multi_reduction <add>, %13, %cst_5 [1] : vector<4x256xf32> to vector<4xf32>
    %15 = vector.shape_cast %14 : vector<4xf32> to vector<4x1xf32>
    %16 = arith.addf %7, %15 : vector<4x1xf32>
    %17 = arith.mulf %13, %13 : vector<4x256xf32>
    %cst_6 = arith.constant dense<0.000000e+00> : vector<4xf32>
    %18 = vector.multi_reduction <add>, %17, %cst_6 [1] : vector<4x256xf32> to vector<4xf32>
    %19 = vector.shape_cast %18 : vector<4xf32> to vector<4x1xf32>
    %20 = arith.addf %11, %19 : vector<4x1xf32>
    %cst_7 = arith.constant 0.001953125 : f32
    %21 = vector.broadcast %cst_7 : f32 to vector<4x1xf32>
    %22 = arith.mulf %16, %21 : vector<4x1xf32>
    %cst_8 = arith.constant 0.001953125 : f32
    %23 = vector.broadcast %cst_8 : f32 to vector<4x1xf32>
    %24 = arith.mulf %20, %23 : vector<4x1xf32>
    %25 = arith.mulf %22, %22 : vector<4x1xf32>
    %26 = arith.subf %24, %25 : vector<4x1xf32>
    %c0_9 = arith.constant 0 : index
    %c0_10 = arith.constant 0 : index
    %27 = vector.load %arg1[%c0_9, %c0_10] : memref<4x1xf32, #tpu.memory_space<vmem>>, vector<4x1xf32>
    %cst_11 = arith.constant 9.99999974E-6 : f32
    %28 = vector.broadcast %cst_11 : f32 to vector<4x1xf32>
    %29 = arith.addf %26, %28 : vector<4x1xf32>
    %30 = math.rsqrt %29 : vector<4x1xf32>
    %31 = arith.mulf %27, %30 : vector<4x1xf32>
    %c0_12 = arith.constant 0 : index
    %c0_13 = arith.constant 0 : index
    %32 = vector.load %arg2[%c0_12, %c0_13] : memref<4x1xf32, #tpu.memory_space<vmem>>, vector<4x1xf32>
    %33 = arith.mulf %22, %31 : vector<4x1xf32>
    %34 = arith.subf %32, %33 : vector<4x1xf32>
    %35 = tpu.iota {dimensions = array<i32: 1>} : vector<1x256xi32>
    %c15_i32 = arith.constant 15 : i32
    %36 = vector.broadcast %c15_i32 : i32 to vector<1x256xi32>
    %37 = arith.andi %35, %36 : vector<1x256xi32>
    %c15_i32_14 = arith.constant 15 : i32
    %38 = vector.broadcast %c15_i32_14 : i32 to vector<1x256xi32>
    %39 = arith.cmpi ne, %37, %38 : vector<1x256xi32>
    %40 = arith.extui %39 : vector<1x256xi1> to vector<1x256xi32>
    %41 = arith.sitofp %40 : vector<1x256xi32> to vector<1x256xf32>
    %c0_i32 = arith.constant 0 : i32
    %42 = vector.broadcast %c0_i32 : i32 to vector<1x256xi32>
    %43 = arith.cmpi ne, %37, %42 : vector<1x256xi32>
    %44 = arith.extui %43 : vector<1x256xi1> to vector<1x256xi32>
    %45 = arith.sitofp %44 : vector<1x256xi32> to vector<1x256xf32>
    %cst_15 = arith.constant 0.000000e+00 : f32
    %46 = vector.broadcast %cst_15 : f32 to vector<24x290xf32>
    %c0_16 = arith.constant 0 : index
    %c0_17 = arith.constant 0 : index
    %47 = vector.load %arg6[%c0_16, %c0_17] : memref<24x290xf32, #tpu.memory_space<vmem>>, vector<24x290xf32>
    tpu.vector_store %arg6[%c0_16, %c0_17], %46 {strides = array<i32>} : memref<24x290xf32, #tpu.memory_space<vmem>>, vector<24x290xf32>,
    %48 = vector.extract_strided_slice %0 {offsets = [0, 0, 0], sizes = [1, 4, 256], strides = [1, 1, 1]} : vector<2x4x256xf32> to vector<1x4x256xf32>
    %49 = vector.shape_cast %48 : vector<1x4x256xf32> to vector<4x256xf32>
    %50 = vector.broadcast %31 : vector<4x1xf32> to vector<4x256xf32>
    %51 = arith.mulf %49, %50 : vector<4x256xf32>
    %52 = vector.broadcast %34 : vector<4x1xf32> to vector<4x256xf32>
    %53 = arith.addf %51, %52 : vector<4x256xf32>
    %cst_18 = arith.constant 0.000000e+00 : f32
    %54 = vector.broadcast %cst_18 : f32 to vector<4x256xf32>
    %55 = arith.maximumf %53, %54 : vector<4x256xf32>
    %56 = vector.broadcast %41 : vector<1x256xf32> to vector<4x256xf32>
    %57 = arith.mulf %55, %56 : vector<4x256xf32>
    %58 = vector.broadcast %45 : vector<1x256xf32> to vector<4x256xf32>
    %59 = arith.mulf %55, %58 : vector<4x256xf32>
    %c0_19 = arith.constant 0 : index
    %c17 = arith.constant 17 : index
    %60 = vector.load %arg6[%c0_19, %c17] : memref<24x290xf32, #tpu.memory_space<vmem>>, vector<4x256xf32>
    tpu.vector_store %arg6[%c0_19, %c17], %57 {strides = array<i32>} : memref<24x290xf32, #tpu.memory_space<vmem>>, vector<4x256xf32>,
    %c4 = arith.constant 4 : index
    %c17_20 = arith.constant 17 : index
    %61 = vector.load %arg6[%c4, %c17_20] : memref<24x290xf32, #tpu.memory_space<vmem>>, vector<4x256xf32>
    tpu.vector_store %arg6[%c4, %c17_20], %55 {strides = array<i32>} : memref<24x290xf32, #tpu.memory_space<vmem>>, vector<4x256xf32>,
    %c8 = arith.constant 8 : index
    %c17_21 = arith.constant 17 : index
    %62 = vector.load %arg6[%c8, %c17_21] : memref<24x290xf32, #tpu.memory_space<vmem>>, vector<4x256xf32>
    tpu.vector_store %arg6[%c8, %c17_21], %59 {strides = array<i32>} : memref<24x290xf32, #tpu.memory_space<vmem>>, vector<4x256xf32>,
    %63 = vector.extract_strided_slice %0 {offsets = [1, 0, 0], sizes = [1, 4, 256], strides = [1, 1, 1]} : vector<2x4x256xf32> to vector<1x4x256xf32>
    %64 = vector.shape_cast %63 : vector<1x4x256xf32> to vector<4x256xf32>
    %65 = vector.broadcast %31 : vector<4x1xf32> to vector<4x256xf32>
    %66 = arith.mulf %64, %65 : vector<4x256xf32>
    %67 = vector.broadcast %34 : vector<4x1xf32> to vector<4x256xf32>
    %68 = arith.addf %66, %67 : vector<4x256xf32>
    %cst_22 = arith.constant 0.000000e+00 : f32
    %69 = vector.broadcast %cst_22 : f32 to vector<4x256xf32>
    %70 = arith.maximumf %68, %69 : vector<4x256xf32>
    %71 = vector.broadcast %41 : vector<1x256xf32> to vector<4x256xf32>
    %72 = arith.mulf %70, %71 : vector<4x256xf32>
    %73 = vector.broadcast %45 : vector<1x256xf32> to vector<4x256xf32>
    %74 = arith.mulf %70, %73 : vector<4x256xf32>
    %c12 = arith.constant 12 : index
    %c17_23 = arith.constant 17 : index
    %75 = vector.load %arg6[%c12, %c17_23] : memref<24x290xf32, #tpu.memory_space<vmem>>, vector<4x256xf32>
    tpu.vector_store %arg6[%c12, %c17_23], %72 {strides = array<i32>} : memref<24x290xf32, #tpu.memory_space<vmem>>, vector<4x256xf32>,
    %c16 = arith.constant 16 : index
    %c17_24 = arith.constant 17 : index
    %76 = vector.load %arg6[%c16, %c17_24] : memref<24x290xf32, #tpu.memory_space<vmem>>, vector<4x256xf32>
    tpu.vector_store %arg6[%c16, %c17_24], %70 {strides = array<i32>} : memref<24x290xf32, #tpu.memory_space<vmem>>, vector<4x256xf32>,
    %c20 = arith.constant 20 : index
    %c17_25 = arith.constant 17 : index
    %77 = vector.load %arg6[%c20, %c17_25] : memref<24x290xf32, #tpu.memory_space<vmem>>, vector<4x256xf32>
    tpu.vector_store %arg6[%c20, %c17_25], %74 {strides = array<i32>} : memref<24x290xf32, #tpu.memory_space<vmem>>, vector<4x256xf32>,
    %c0_26 = arith.constant 0 : index
    %c0_27 = arith.constant 0 : index
    %78 = vector.load %arg6[%c0_26, %c0_27] : memref<24x290xf32, #tpu.memory_space<vmem>>, vector<4x256xf32>
    %c0_28 = arith.constant 0 : index
    %c0_29 = arith.constant 0 : index
    %79 = vector.load %arg7[%c0_28, %c0_29] : memref<36x512xf32, #tpu.memory_space<vmem>>, vector<4x256xf32>
    tpu.vector_store %arg7[%c0_28, %c0_29], %78 {strides = array<i32>} : memref<36x512xf32, #tpu.memory_space<vmem>>, vector<4x256xf32>,
    %c4_30 = arith.constant 4 : index
    %c1 = arith.constant 1 : index
    %80 = vector.load %arg6[%c4_30, %c1] : memref<24x290xf32, #tpu.memory_space<vmem>>, vector<4x256xf32>
    %c4_31 = arith.constant 4 : index
    %c0_32 = arith.constant 0 : index
    %81 = vector.load %arg7[%c4_31, %c0_32] : memref<36x512xf32, #tpu.memory_space<vmem>>, vector<4x256xf32>
    tpu.vector_store %arg7[%c4_31, %c0_32], %80 {strides = array<i32>} : memref<36x512xf32, #tpu.memory_space<vmem>>, vector<4x256xf32>,
    %c8_33 = arith.constant 8 : index
    %c2 = arith.constant 2 : index
    %82 = vector.load %arg6[%c8_33, %c2] : memref<24x290xf32, #tpu.memory_space<vmem>>, vector<4x256xf32>
    %c8_34 = arith.constant 8 : index
    %c0_35 = arith.constant 0 : index
    %83 = vector.load %arg7[%c8_34, %c0_35] : memref<36x512xf32, #tpu.memory_space<vmem>>, vector<4x256xf32>
    tpu.vector_store %arg7[%c8_34, %c0_35], %82 {strides = array<i32>} : memref<36x512xf32, #tpu.memory_space<vmem>>, vector<4x256xf32>,
    %c0_36 = arith.constant 0 : index
    %c16_37 = arith.constant 16 : index
    %84 = vector.load %arg6[%c0_36, %c16_37] : memref<24x290xf32, #tpu.memory_space<vmem>>, vector<4x256xf32>
    %c12_38 = arith.constant 12 : index
    %c0_39 = arith.constant 0 : index
    %85 = vector.load %arg7[%c12_38, %c0_39] : memref<36x512xf32, #tpu.memory_space<vmem>>, vector<4x256xf32>
    tpu.vector_store %arg7[%c12_38, %c0_39], %84 {strides = array<i32>} : memref<36x512xf32, #tpu.memory_space<vmem>>, vector<4x256xf32>,
    %c4_40 = arith.constant 4 : index
    %c17_41 = arith.constant 17 : index
    %86 = vector.load %arg6[%c4_40, %c17_41] : memref<24x290xf32, #tpu.memory_space<vmem>>, vector<4x256xf32>
    %c16_42 = arith.constant 16 : index
    %c0_43 = arith.constant 0 : index
    %87 = vector.load %arg7[%c16_42, %c0_43] : memref<36x512xf32, #tpu.memory_space<vmem>>, vector<4x256xf32>
    tpu.vector_store %arg7[%c16_42, %c0_43], %86 {strides = array<i32>} : memref<36x512xf32, #tpu.memory_space<vmem>>, vector<4x256xf32>,
    %c8_44 = arith.constant 8 : index
    %c18 = arith.constant 18 : index
    %88 = vector.load %arg6[%c8_44, %c18] : memref<24x290xf32, #tpu.memory_space<vmem>>, vector<4x256xf32>
    %c20_45 = arith.constant 20 : index
    %c0_46 = arith.constant 0 : index
    %89 = vector.load %arg7[%c20_45, %c0_46] : memref<36x512xf32, #tpu.memory_space<vmem>>, vector<4x256xf32>
    tpu.vector_store %arg7[%c20_45, %c0_46], %88 {strides = array<i32>} : memref<36x512xf32, #tpu.memory_space<vmem>>, vector<4x256xf32>,
    %c0_47 = arith.constant 0 : index
    %c32 = arith.constant 32 : index
    %90 = vector.load %arg6[%c0_47, %c32] : memref<24x290xf32, #tpu.memory_space<vmem>>, vector<4x256xf32>
    %c24 = arith.constant 24 : index
    %c0_48 = arith.constant 0 : index
    %91 = vector.load %arg7[%c24, %c0_48] : memref<36x512xf32, #tpu.memory_space<vmem>>, vector<4x256xf32>
    tpu.vector_store %arg7[%c24, %c0_48], %90 {strides = array<i32>} : memref<36x512xf32, #tpu.memory_space<vmem>>, vector<4x256xf32>,
    %c4_49 = arith.constant 4 : index
    %c33 = arith.constant 33 : index
    %92 = vector.load %arg6[%c4_49, %c33] : memref<24x290xf32, #tpu.memory_space<vmem>>, vector<4x256xf32>
    %c28 = arith.constant 28 : index
    %c0_50 = arith.constant 0 : index
    %93 = vector.load %arg7[%c28, %c0_50] : memref<36x512xf32, #tpu.memory_space<vmem>>, vector<4x256xf32>
    tpu.vector_store %arg7[%c28, %c0_50], %92 {strides = array<i32>} : memref<36x512xf32, #tpu.memory_space<vmem>>, vector<4x256xf32>,
    %c8_51 = arith.constant 8 : index
    %c34 = arith.constant 34 : index
    %94 = vector.load %arg6[%c8_51, %c34] : memref<24x290xf32, #tpu.memory_space<vmem>>, vector<4x256xf32>
    %c32_52 = arith.constant 32 : index
    %c0_53 = arith.constant 0 : index
    %95 = vector.load %arg7[%c32_52, %c0_53] : memref<36x512xf32, #tpu.memory_space<vmem>>, vector<4x256xf32>
    tpu.vector_store %arg7[%c32_52, %c0_53], %94 {strides = array<i32>} : memref<36x512xf32, #tpu.memory_space<vmem>>, vector<4x256xf32>,
    %c12_54 = arith.constant 12 : index
    %c0_55 = arith.constant 0 : index
    %96 = vector.load %arg6[%c12_54, %c0_55] : memref<24x290xf32, #tpu.memory_space<vmem>>, vector<4x256xf32>
    %c0_56 = arith.constant 0 : index
    %c256 = arith.constant 256 : index
    %97 = vector.load %arg7[%c0_56, %c256] : memref<36x512xf32, #tpu.memory_space<vmem>>, vector<4x256xf32>
    tpu.vector_store %arg7[%c0_56, %c256], %96 {strides = array<i32>} : memref<36x512xf32, #tpu.memory_space<vmem>>, vector<4x256xf32>,
    %c16_57 = arith.constant 16 : index
    %c1_58 = arith.constant 1 : index
    %98 = vector.load %arg6[%c16_57, %c1_58] : memref<24x290xf32, #tpu.memory_space<vmem>>, vector<4x256xf32>
    %c4_59 = arith.constant 4 : index
    %c256_60 = arith.constant 256 : index
    %99 = vector.load %arg7[%c4_59, %c256_60] : memref<36x512xf32, #tpu.memory_space<vmem>>, vector<4x256xf32>
    tpu.vector_store %arg7[%c4_59, %c256_60], %98 {strides = array<i32>} : memref<36x512xf32, #tpu.memory_space<vmem>>, vector<4x256xf32>,
    %c20_61 = arith.constant 20 : index
    %c2_62 = arith.constant 2 : index
    %100 = vector.load %arg6[%c20_61, %c2_62] : memref<24x290xf32, #tpu.memory_space<vmem>>, vector<4x256xf32>
    %c8_63 = arith.constant 8 : index
    %c256_64 = arith.constant 256 : index
    %101 = vector.load %arg7[%c8_63, %c256_64] : memref<36x512xf32, #tpu.memory_space<vmem>>, vector<4x256xf32>
    tpu.vector_store %arg7[%c8_63, %c256_64], %100 {strides = array<i32>} : memref<36x512xf32, #tpu.memory_space<vmem>>, vector<4x256xf32>,
    %c12_65 = arith.constant 12 : index
    %c16_66 = arith.constant 16 : index
    %102 = vector.load %arg6[%c12_65, %c16_66] : memref<24x290xf32, #tpu.memory_space<vmem>>, vector<4x256xf32>
    %c12_67 = arith.constant 12 : index
    %c256_68 = arith.constant 256 : index
    %103 = vector.load %arg7[%c12_67, %c256_68] : memref<36x512xf32, #tpu.memory_space<vmem>>, vector<4x256xf32>
    tpu.vector_store %arg7[%c12_67, %c256_68], %102 {strides = array<i32>} : memref<36x512xf32, #tpu.memory_space<vmem>>, vector<4x256xf32>,
    %c16_69 = arith.constant 16 : index
    %c17_70 = arith.constant 17 : index
    %104 = vector.load %arg6[%c16_69, %c17_70] : memref<24x290xf32, #tpu.memory_space<vmem>>, vector<4x256xf32>
    %c16_71 = arith.constant 16 : index
    %c256_72 = arith.constant 256 : index
    %105 = vector.load %arg7[%c16_71, %c256_72] : memref<36x512xf32, #tpu.memory_space<vmem>>, vector<4x256xf32>
    tpu.vector_store %arg7[%c16_71, %c256_72], %104 {strides = array<i32>} : memref<36x512xf32, #tpu.memory_space<vmem>>, vector<4x256xf32>,
    %c20_73 = arith.constant 20 : index
    %c18_74 = arith.constant 18 : index
    %106 = vector.load %arg6[%c20_73, %c18_74] : memref<24x290xf32, #tpu.memory_space<vmem>>, vector<4x256xf32>
    %c20_75 = arith.constant 20 : index
    %c256_76 = arith.constant 256 : index
    %107 = vector.load %arg7[%c20_75, %c256_76] : memref<36x512xf32, #tpu.memory_space<vmem>>, vector<4x256xf32>
    tpu.vector_store %arg7[%c20_75, %c256_76], %106 {strides = array<i32>} : memref<36x512xf32, #tpu.memory_space<vmem>>, vector<4x256xf32>,
    %c12_77 = arith.constant 12 : index
    %c32_78 = arith.constant 32 : index
    %108 = vector.load %arg6[%c12_77, %c32_78] : memref<24x290xf32, #tpu.memory_space<vmem>>, vector<4x256xf32>
    %c24_79 = arith.constant 24 : index
    %c256_80 = arith.constant 256 : index
    %109 = vector.load %arg7[%c24_79, %c256_80] : memref<36x512xf32, #tpu.memory_space<vmem>>, vector<4x256xf32>
    tpu.vector_store %arg7[%c24_79, %c256_80], %108 {strides = array<i32>} : memref<36x512xf32, #tpu.memory_space<vmem>>, vector<4x256xf32>,
    %c16_81 = arith.constant 16 : index
    %c33_82 = arith.constant 33 : index
    %110 = vector.load %arg6[%c16_81, %c33_82] : memref<24x290xf32, #tpu.memory_space<vmem>>, vector<4x256xf32>
    %c28_83 = arith.constant 28 : index
    %c256_84 = arith.constant 256 : index
    %111 = vector.load %arg7[%c28_83, %c256_84] : memref<36x512xf32, #tpu.memory_space<vmem>>, vector<4x256xf32>
    tpu.vector_store %arg7[%c28_83, %c256_84], %110 {strides = array<i32>} : memref<36x512xf32, #tpu.memory_space<vmem>>, vector<4x256xf32>,
    %c20_85 = arith.constant 20 : index
    %c34_86 = arith.constant 34 : index
    %112 = vector.load %arg6[%c20_85, %c34_86] : memref<24x290xf32, #tpu.memory_space<vmem>>, vector<4x256xf32>
    %c32_87 = arith.constant 32 : index
    %c256_88 = arith.constant 256 : index
    %113 = vector.load %arg7[%c32_87, %c256_88] : memref<36x512xf32, #tpu.memory_space<vmem>>, vector<4x256xf32>
    tpu.vector_store %arg7[%c32_87, %c256_88], %112 {strides = array<i32>} : memref<36x512xf32, #tpu.memory_space<vmem>>, vector<4x256xf32>,
    %c0_89 = arith.constant 0 : index
    %c0_90 = arith.constant 0 : index
    %114 = vector.load %arg4[%c0_89, %c0_90] : memref<8x36xf32, #tpu.memory_space<vmem>>, vector<8x36xf32>
    %c0_91 = arith.constant 0 : index
    %c0_92 = arith.constant 0 : index
    %115 = vector.load %arg7[%c0_91, %c0_92] : memref<36x512xf32, #tpu.memory_space<vmem>>, vector<36x512xf32>
    %cst_93 = arith.constant dense<0.000000e+00> : vector<8x512xf32>
    %116 = tpu.matmul %114, %115, %cst_93 {dimension_numbers = #tpu.dot_dimension_numbers<[1], [0], [0], [1], [0, 0, 1, 1], [], []>} : vector<8x36xf32>, vector<36x512xf32>, vector<8x512xf32> -> vector<8x512xf32>
    %117 = vector.extract_strided_slice %116 {offsets = [0, 0], sizes = [8, 256], strides = [1, 1]} : vector<8x512xf32> to vector<8x256xf32>
    %118 = vector.extract_strided_slice %0 {offsets = [0, 0, 0], sizes = [1, 4, 256], strides = [1, 1, 1]} : vector<2x4x256xf32> to vector<1x4x256xf32>
    %119 = vector.shape_cast %118 : vector<1x4x256xf32> to vector<4x256xf32>
    %120 = tpu.concatenate %119, %117 in 0 : vector<4x256xf32>, vector<8x256xf32> -> vector<12x256xf32>
    %c0_94 = arith.constant 0 : index
    %c0_95 = arith.constant 0 : index
    %c0_96 = arith.constant 0 : index
    %121 = vector.load %arg5[%c0_94, %c0_95, %c0_96] : memref<2x12x256xf32, #tpu.memory_space<vmem>>, vector<1x12x256xf32>
    %122 = vector.shape_cast %121 : vector<1x12x256xf32> to vector<12x256xf32>
    %123 = vector.shape_cast %120 : vector<12x256xf32> to vector<1x12x256xf32>
    tpu.vector_store %arg5[%c0_94, %c0_95, %c0_96], %123 {strides = array<i32>} : memref<2x12x256xf32, #tpu.memory_space<vmem>>, vector<1x12x256xf32>,
    %124 = vector.extract_strided_slice %116 {offsets = [0, 256], sizes = [8, 256], strides = [1, 1]} : vector<8x512xf32> to vector<8x256xf32>
    %125 = vector.extract_strided_slice %0 {offsets = [1, 0, 0], sizes = [1, 4, 256], strides = [1, 1, 1]} : vector<2x4x256xf32> to vector<1x4x256xf32>
    %126 = vector.shape_cast %125 : vector<1x4x256xf32> to vector<4x256xf32>
    %127 = tpu.concatenate %126, %124 in 0 : vector<4x256xf32>, vector<8x256xf32> -> vector<12x256xf32>
    %c1_97 = arith.constant 1 : index
    %c0_98 = arith.constant 0 : index
    %c0_99 = arith.constant 0 : index
    %128 = vector.load %arg5[%c1_97, %c0_98, %c0_99] : memref<2x12x256xf32, #tpu.memory_space<vmem>>, vector<1x12x256xf32>
    %129 = vector.shape_cast %128 : vector<1x12x256xf32> to vector<12x256xf32>
    %130 = vector.shape_cast %127 : vector<12x256xf32> to vector<1x12x256xf32>
    tpu.vector_store %arg5[%c1_97, %c0_98, %c0_99], %130 {strides = array<i32>} : memref<2x12x256xf32, #tpu.memory_space<vmem>>, vector<1x12x256xf32>,
    return
  }
  func.func @transform_0(%arg0: i32) -> (i32, i32) {
    %c0_i32 = arith.constant 0 : i32
    %c0_i32_0 = arith.constant 0 : i32
    %c0_i32_1 = arith.constant 0 : i32
    return %c0_i32, %c0_i32_0 : i32, i32
  }
  func.func @transform_1(%arg0: i32) -> (i32, i32) {
    %c0_i32 = arith.constant 0 : i32
    %c0_i32_0 = arith.constant 0 : i32
    %c0_i32_1 = arith.constant 0 : i32
    return %c0_i32, %c0_i32_0 : i32, i32
  }
  func.func @transform_2(%arg0: i32) -> (i32, i32, i32) {
    %c0_i32 = arith.constant 0 : i32
    %c0_i32_0 = arith.constant 0 : i32
    %c0_i32_1 = arith.constant 0 : i32
    %c0_i32_2 = arith.constant 0 : i32
    return %c0_i32, %c0_i32_0, %c0_i32_1 : i32, i32, i32
  }
  func.func @transform_3(%arg0: i32) -> (i32, i32) {
    %c0_i32 = arith.constant 0 : i32
    %c0_i32_0 = arith.constant 0 : i32
    %c0_i32_1 = arith.constant 0 : i32
    return %c0_i32, %c0_i32_0 : i32, i32
  }
  func.func @transform_4(%arg0: i32) -> (i32, i32, i32) {
    %c0_i32 = arith.constant 0 : i32
    %c0_i32_0 = arith.constant 0 : i32
    %c0_i32_1 = arith.constant 0 : i32
    %c0_i32_2 = arith.constant 0 : i32
    return %c0_i32, %c0_i32_0, %c0_i32_1 : i32, i32, i32
  }
}

</mosaic_0001>

<bundles_post_ra>
// kernel: dense_layer_forward.1
= control target key start
LH: loop header
LB: loop body
LE: loop exit
PB: predicated region body
PF: predicated region fallthrough
CT: control target
= control target key end

     0   :  { %vm22_vm0 = vcmask 1043456   ;;  %v795_v20 = vmov 0   ;;  %v796_v38 = vmov 0.0   ;;  %v69_v39 = vlaneseq  ;;  %s800_s22 = smov 95   ;;  %s801_s23 = smov 127   ;;  %s1015_s2 = inlined_call_operand.vmem [shape: f32[2,4,256], index: 2, kind: input, shape index: {}]   ;;  %s1016_s0 = inlined_call_operand.vmem [shape: f32[4,1], index: 0, kind: input, shape index: {}]   ;;  %s1017_s1 = inlined_call_operand.vmem [shape: f32[4,1], index: 1, kind: input, shape index: {}]   ;;  %s1018_s3 = inlined_call_operand.vmem [shape: f32[8,36], index: 3, kind: input, shape index: {}]   ;;  %s1019_s4 = inlined_call_operand.vmem [shape: f32[2,12,256], index: 4, kind: output, shape index: {}]  }
   0x1   :  { %v835_v0 = vld [vmem:[%s1015_s2] sm:$0xff]  ;;  %v840_v1 = vld [vmem:[%s1015_s2 + $0x8] sm:$0xff]  ;;  %789 = vset.pattern.permute.xlu0 %v795_v20  ;;  %790 = vset.pattern.permute.xlu1 %v795_v20  ;;  %86 = vst [vmem:[#allocation2] sm:$0xff] %v796_v38  ;;  %87 = vst [vmem:[#allocation2 + $0x8] sm:$0xff] %v796_v38  ;;  %v797_v40 = vmov 839922192  }
   0x2   :  { %v844_v2 = vcombine.high %v835_v0, %v835_v0  ;;  %v23_v3 = vsel %vm22_vm0, %v835_v0, 0.0  ;;  %v29_v4 = vmul.f32 %v835_v0, %v835_v0  ;;  %v852_v5 = vcombine.high %v840_v1, %v840_v1  ;;  %v62_v32 = vld [vmem:[%s1016_s0] sm:$0xf]  ;;  %90 = vst [vmem:[#allocation2 + $0x18] sm:$0xff] %v796_v38  ;;  %91 = vst [vmem:[#allocation2 + $0x20] sm:$0xff] %v796_v38  ;;  %s798_s0 = smov 17  }
   0x3   :  { %v42_v6 = vsel %vm22_vm0, %v840_v1, 0.0  ;;  %v48_v7 = vmul.f32 %v840_v1, %v840_v1  ;;  %v66_v35 = vld [vmem:[%s1017_s1] sm:$0xf]  ;;  %93 = vst [vmem:[#allocation2 + $0x30] sm:$0xff] %v796_v38  ;;  %94 = vst [vmem:[#allocation2 + $0x38] sm:$0xff] %v796_v38  ;;  %656 = vmatprep.mubr.f32.mxu0 %v796_v38  ;;  %727 = vmatprep.mubr.f32.mxu1 %v796_v38  ;;  %v101_v41 = vunpack.c.l.s4 %v797_v40  ;;  %v70_v42 = vand.u32 127, %v69_v39 }
   0x4   :  { %v24_v8 = vsel %vm22_vm0, %v844_v2, 0.0  ;;  %v31_v9 = vcombine.high %v29_v4, %v29_v4  ;;  %v33_v10 = vsel %vm22_vm0, %v29_v4, 0.0  ;;  %v43_v11 = vsel %vm22_vm0, %v852_v5, 0.0  ;;  %s799_s1 = smov 111   ;;  %s802_s24 = smov 94  }
   0x5   :  { %v25_v12 = vadd.f32 %v24_v8, %v23_v3  ;;  %v50_v13 = vcombine.high %v48_v7, %v48_v7  ;;  %v52_v15 = vsel %vm22_vm0, %v48_v7, 0.0  ;;  %v44_v17 = vadd.f32 %v43_v11, %v42_v6  ;;  %s803_s25 = smov 96   ;;  %s804_s26 = smov 126  }
   0x6   :  { %v34_v14 = vsel %vm22_vm0, %v31_v9, 0.0  ;;  %v102_v43 = vunpack.c.0.s8 %v101_v41  ;;  %v104_v44 = vshrl.u32 %v69_v39, 7  ;;  %v71_v45 = vadd.s32 128, %v70_v42  ;;  %s805_s27 = smov 110   ;;  %s806_s28 = smov 112  }
   0x7   :  { %26 = vadd.xlane.f32.xlu0 %v25_v12  ;;  %v35_v16 = vadd.f32 %v34_v14, %v33_v10  ;;  %v53_v18 = vsel %vm22_vm0, %v50_v13, 0.0  ;;  %vm88_vm1 = vcmask 277504   ;;  %v72_v47 = vand.u32 15, %v70_v42 }
   0x8   :  { %v54_v19 = vadd.f32 %v53_v18, %v52_v15  ;;  %v105_v46 = vsub.s32 %v102_v43, %v104_v44  ;;  %89 = vst.msk [vmem:[#allocation2 + $0x10] sm:$0xff] %vm88_vm1, %v796_v38  ;;  %92 = vst.msk [vmem:[#allocation2 + $0x28] sm:$0xff] %vm88_vm1, %v796_v38  ;;  %v73_v48 = vand.u32 15, %v71_v45  ;;  %vm144_vm6 = vcmask 1043592  }
   0x9   :  { %36 = vadd.xlane.f32.xlu1 %v35_v16  ;;  %95 = vst.msk [vmem:[#allocation2 + $0x40] sm:$0xff] %vm88_vm1, %v796_v38  ;;  %vm80_vm2 = vcmp.ne.s32.totalorder %v72_v47, 0  ;;  %vm74_vm4 = vcmp.ne.s32.totalorder %v72_v47, 15  ;;  %vm162_vm7 = vcmask 138244   ;;  %vm139_vm8 = vcmask 138240  }
   0xa   :  { %vm81_vm3 = vcmp.ne.s32.totalorder %v73_v48, 0  ;;  %vm75_vm5 = vcmp.ne.s32.totalorder %v73_v48, 15  ;;  %v765_v55 = vsel %vm80_vm2, 1.0, %v796_v38  ;;  %v763_v57 = vsel %vm74_vm4, 1.0, %v796_v38 }
   0xb   :  { %45 = vadd.xlane.f32.xlu0 %v44_v17  ;;  %v766_v56 = vsel %vm81_vm3, 1.0, %v796_v38  ;;  %v764_v58 = vsel %vm75_vm5, 1.0, %v796_v38  ;;  %vm147_vm9 = vcmask 134144   ;;  %vm159_vm10 = vcmask 1047692  }
   0xc   :  { %v130_v63 = vcombine.low %v765_v55, %v766_v56  ;;  %v125_v3 = vcombine.low %v763_v57, %v764_v58  ;;  %vm360_vm11 = vcmask 777216   ;;  %vm300_vm12 = vcmask 908288  }
   0xd   :  { %55 = vadd.xlane.f32.xlu1 %v54_v19  ;;  %vm237_vm13 = vcmask 1039360   ;;  %vm379_vm14 = vcmask 769024   ;;  %vm341_vm15 = vcmask 785408   ;;  %vm322_vm1 = vcmask 900096  }
   0xe   :  { %vm256_vm2 = vcmask 1031168   ;;  %vm278_vm3 = vcmask 916480   ;;  %vm576_vm4 = vcmask 293888  }
  0x90   :  { %v27_v21 = vpop.xlane.xlu0 %26 }
  0x92   :  { %v37_v22 = vpop.xlane.xlu1 %36 }
  0x94   :  { %v46_v23 = vpop.xlane.xlu0 %45 }
  0x95   :  { %v47_v24 = vadd.f32 %v46_v23, %v27_v21 }
  0x96   :  { %v56_v25 = vpop.xlane.xlu1 %55 }
  0x97   :  { %v58_v26 = vmul.f32 0.001953125, %v47_v24  ;;  %v57_v27 = vadd.f32 %v56_v25, %v37_v22 }
  0x99   :  { %v60_v28 = vmul.f32 %v58_v26, %v58_v26  ;;  %v59_v29 = vmul.f32 0.001953125, %v57_v27 }
  0x9b   :  { %v61_v30 = vsub.f32 %v59_v29, %v60_v28 }
  0x9d   :  { %v63_v31 = vadd.f32 1e-05, %v61_v30 }
  0x9f   :  { %793 = vrsqrt.f32 %v63_v31 }
  0xac   :  { %v794_v33 = vpop.eup %793 }
  0xad   :  { %v65_v34 = vmul.f32 %v794_v33, %v62_v32 }
  0xaf   :  { %98 = vperm.xlu0 %789, %v65_v34   ;;  %v67_v36 = vmul.f32 %v65_v34, %v58_v26 }
  0xb1   :  { %v68_v37 = vsub.f32 %v66_v35, %v67_v36 }
  0xb3   :  { %111 = vperm.xlu1 %790, %v68_v37  }
 0x12a   :  { %v99_v49 = vpop.permute.xlu0 %98 }
 0x12b   :  { %v106_v50 = vrot.slane %v99_v49, %v105_v46 }
 0x12d   :  { %v108_v52 = vmul.f32 %v106_v50, %v835_v0  ;;  %v177_v53 = vmul.f32 %v106_v50, %v840_v1 }
 0x12e   :  { %v112_v51 = vpop.permute.xlu1 %111 }
 0x12f   :  { %v119_v54 = vrot.slane %v112_v51, %v105_v46 }
 0x131   :  { %v121_v59 = vadd.f32 %v119_v54, %v108_v52  ;;  %v178_v60 = vadd.f32 %v177_v53, %v119_v54 }
 0x133   :  { %v122_v61 = vmax.f32 %v121_v59, 0.0  ;;  %v179_v62 = vmax.f32 %v178_v60, 0.0 }
 0x135   :  { %197 = vrot.lane.b32.xlu1 %v179_v62, %s798_s0  ;;  %153 = vrot.lane.b32.xlu0 %v122_v61, %s798_s0  ;;  %v181_v4 = vmul.f32 %v179_v62, %v130_v63  ;;  %v196_v6 = vcombine.high %v179_v62, %v179_v62  ;;  %v127_v7 = vmul.f32 %v125_v3, %v122_v61 }
 0x136   :  { %v132_v8 = vmul.f32 %v130_v63, %v122_v61  ;;  %v180_v10 = vmul.f32 %v179_v62, %v125_v3  ;;  %v150_v11 = vcombine.low %v122_v61, %v122_v61 }
 0x137   :  { %v134_v9 = vcombine.high %v127_v7, %v127_v7  ;;  %v209_v12 = vcombine.low %v181_v4, %v181_v4 }
 0x138   :  { %v165_v13 = vcombine.high %v132_v8, %v132_v8  ;;  %v183_v14 = vcombine.low %v180_v10, %v180_v10 }
 0x139   :  { %212 = vrot.lane.b32.xlu1 %v181_v4, %s798_s0  ;;  %199 = vrot.lane.b32.xlu0 %v196_v6, %s798_s0 }
 0x13d   :  { %166 = vrot.lane.b32.xlu1 %v132_v8, %s798_s0  ;;  %137 = vrot.lane.b32.xlu0 %v134_v9, %s798_s0 }
 0x141   :  { %186 = vrot.lane.b32.xlu1 %v180_v10, %s798_s0 }
 0x145   :  { %135 = vrot.lane.b32.xlu1 %v127_v7, %s798_s0 }
 0x149   :  { %151 = vrot.lane.b32.xlu1 %v150_v11, %s798_s0 }
 0x14d   :  { %210 = vrot.lane.b32.xlu1 %v209_v12, %s798_s0 }
 0x151   :  { %168 = vrot.lane.b32.xlu1 %v165_v13, %s798_s0 }
 0x155   :  { %184 = vrot.lane.b32.xlu1 %v183_v14, %s798_s0 }
 0x1a7   :  { %v198_v15 = vpop.permute.xlu1 %197  ;;  %v154_v16 = vpop.permute.xlu0 %153 }
 0x1a8   :  { %205 = vst.msk [vmem:[#allocation2 + $0x30] sm:$0xf] %vm144_vm6, %v198_v15 }
 0x1a9   :  { %163 = vst.msk [vmem:[#allocation2 + $0x10] sm:$0xf0] %vm162_vm7, %v154_v16 }
 0x1ab   :  { %v213_v17 = vpop.permute.xlu1 %212  ;;  %v200_v18 = vpop.permute.xlu0 %199 }
 0x1ac   :  { %220 = vst.msk [vmem:[#allocation2 + $0x40] sm:$0xf0] %vm162_vm7, %v213_v17  ;;  %v201_v19 = vsel %vm139_vm8, %v198_v15, %v200_v18 }
 0x1ad   :  { %207 = vst.msk [vmem:[#allocation2 + $0x40] sm:$0xf] %vm147_vm9, %v200_v18  ;;  %206 = vst [vmem:[#allocation2 + $0x38] sm:$0xf] %v201_v19 }
 0x1af   :  { %v167_v20 = vpop.permute.xlu1 %166  ;;  %v138_v21 = vpop.permute.xlu0 %137  ;;  %v456_v22 = vld [vmem:[#allocation2 + $0x30] sm:$0xf] }
 0x1b0   :  { %v350_v23 = vld [vmem:[#allocation2 + $0x10] sm:$0xf0]  ;;  %174 = vst.msk [vmem:[#allocation2 + $0x18] sm:$0xf] %vm144_vm6, %v167_v20  ;;  %462 = vrot.lane.b32.xlu1 %v456_v22, %s799_s1  ;;  %v513_v39 = vld [vmem:[#allocation2 + $0x30] sm:$0xf] }
 0x1b1   :  { %148 = vst.msk [vmem:[#allocation2 + $0x10] sm:$0xf] %vm147_vm9, %v138_v21  ;;  %358 = vrot.lane.b32.xlu0 %v350_v23, %s800_s22  ;;  %v227_v25 = vld [vmem:[#allocation2 + $0x10] sm:$0xf0]  ;;  %v519_v41 = vrot.slane %v513_v39, 4 }
 0x1b2   :  { %v287_v44 = vld [vmem:[#allocation2 + $0x10] sm:$0xf0] }
 0x1b3   :  { %v187_v24 = vpop.permute.xlu1 %186  ;;  %v293_v46 = vrot.slane %v287_v44, 4  ;;  %v476_v56 = vld [vmem:[#allocation2 + $0x40] sm:$0xf0] }
 0x1b4   :  { %194 = vst.msk [vmem:[#allocation2 + $0x28] sm:$0xf0] %vm162_vm7, %v187_v24  ;;  %v457_v47 = vld [vmem:[#allocation2 + $0x38] sm:$0xf]  ;;  %v458_v48 = vld [vmem:[#allocation2 + $0x40] sm:$0xf] }
 0x1b5   :  { %235 = vrot.lane.b32.xlu0 %v227_v25, %s801_s23  ;;  %v536_v59 = vld [vmem:[#allocation2 + $0x40] sm:$0xf0]  ;;  %v514_v62 = vld [vmem:[#allocation2 + $0x38] sm:$0xf]  ;;  %v515_v11 = vld [vmem:[#allocation2 + $0x40] sm:$0xf] }
 0x1b6   :  { %v542_v63 = vrot.slane %v536_v59, 4  ;;  %v520_v3 = vrot.slane %v514_v62, 4  ;;  %v521_v12 = vrot.slane %v515_v11, 4  ;;  %v419_v23 = vld [vmem:[#allocation2 + $0x40] sm:$0xf0] }
 0x1b7   :  { %v136_v26 = vpop.permute.xlu1 %135  ;;  %v367_v27 = vld [vmem:[#allocation2 + $0x18] sm:$0xf]  ;;  %v425_v25 = vrot.slane %v419_v23, 4 }
 0x1b8   :  { %v140_v28 = vsel %vm139_vm8, %v136_v26, %v138_v21  ;;  %145 = vst.msk [vmem:[#allocation2] sm:$0xf] %vm144_vm6, %v136_v26  ;;  %373 = vrot.lane.b32.xlu1 %v367_v27, %s802_s24  ;;  %v244_v37 = vld [vmem:[#allocation2 + $0x18] sm:$0xf]  ;;  %v331_v7 = vld [vmem:[#allocation2 + $0x10] sm:$0xf] }
 0x1b9   :  { %146 = vst [vmem:[#allocation2 + $0x8] sm:$0xf] %v140_v28  ;;  %v307_v14 = vld [vmem:[#allocation2 + $0x18] sm:$0xf] }
 0x1ba   :  { %v313_v15 = vrot.slane %v307_v14, 4 }
 0x1bb   :  { %v152_v29 = vpop.permute.xlu1 %151  ;;  %v440_v58 = vld [vmem:[#allocation2 + $0x28] sm:$0xf0] }
 0x1bc   :  { %v155_v30 = vsel %vm139_vm8, %v152_v29, %v154_v16  ;;  %160 = vst.msk [vmem:[#allocation2] sm:$0xf0] %vm159_vm10, %v152_v29  ;;  %v494_v8 = vld [vmem:[#allocation2 + $0x28] sm:$0xf0] }
 0x1bd   :  { %161 = vst [vmem:[#allocation2 + $0x8] sm:$0xf0] %v155_v30  ;;  %v500_v9 = vrot.slane %v494_v8, 4 }
 0x1bf   :  { %v221_v31 = vld [vmem:[#allocation2] sm:$0xf]  ;;  %v211_v32 = vpop.permute.xlu1 %210 }
 0x1c0   :  { %v329_v33 = vld [vmem:[#allocation2] sm:$0xf]  ;;  %223 = vst [vmem:[#allocation3] sm:$0xf] %v221_v31  ;;  %v214_v34 = vsel %vm139_vm8, %v211_v32, %v213_v17  ;;  %218 = vst.msk [vmem:[#allocation2 + $0x30] sm:$0xf0] %vm159_vm10, %v211_v32 }
 0x1c1   :  { %335 = vrot.lane.b32.xlu1 %v329_v33, %s803_s25  ;;  %219 = vst [vmem:[#allocation2 + $0x38] sm:$0xf0] %v214_v34  ;;  %v222_v35 = vld [vmem:[#allocation2 + $0x8] sm:$0xf]  ;;  %v397_v17 = vld [vmem:[#allocation2 + $0x38] sm:$0xf] }
 0x1c2   :  { %224 = vst [vmem:[#allocation3 + $0x68] sm:$0xf] %v222_v35  ;;  %v330_v61 = vld [vmem:[#allocation2 + $0x8] sm:$0xf]  ;;  %v403_v18 = vrot.slane %v397_v17, 4 }
 0x1c3   :  { %v169_v36 = vpop.permute.xlu1 %168  ;;  %v348_v38 = vld [vmem:[#allocation2] sm:$0xf0]  ;;  %v263_v27 = vld [vmem:[#allocation2] sm:$0xf]  ;;  %v264_v39 = vld [vmem:[#allocation2 + $0x8] sm:$0xf] }
 0x1c4   :  { %v170_v40 = vsel %vm139_vm8, %v167_v20, %v169_v36  ;;  %176 = vst.msk [vmem:[#allocation2 + $0x28] sm:$0xf] %vm147_vm9, %v169_v36  ;;  %354 = vrot.lane.b32.xlu0 %v348_v38, %s800_s22  ;;  %v349_v43 = vld [vmem:[#allocation2 + $0x8] sm:$0xf0]  ;;  %v285_v51 = vld [vmem:[#allocation2] sm:$0xf0] }
 0x1c5   :  { %250 = vrot.lane.b32.xlu1 %v244_v37, %s804_s26  ;;  %175 = vst [vmem:[#allocation2 + $0x20] sm:$0xf] %v170_v40  ;;  %v226_v50 = vld [vmem:[#allocation2 + $0x8] sm:$0xf0]  ;;  %v291_v54 = vrot.slane %v285_v51, 4  ;;  %v269_v29 = vrot.slane %v263_v27, 4 }
 0x1c6   :  { %v286_v4 = vld [vmem:[#allocation2 + $0x8] sm:$0xf0]  ;;  %v398_v34 = vld [vmem:[#allocation2 + $0x40] sm:$0xf] }
 0x1c7   :  { %v185_v42 = vpop.permute.xlu1 %184  ;;  %v292_v6 = vrot.slane %v286_v4, 4  ;;  %v474_v19 = vld [vmem:[#allocation2 + $0x30] sm:$0xf0]  ;;  %v404_v36 = vrot.slane %v398_v34, 4 }
 0x1c8   :  { %v188_v45 = vsel %vm139_vm8, %v185_v42, %v187_v24  ;;  %192 = vst.msk [vmem:[#allocation2 + $0x18] sm:$0xf0] %vm159_vm10, %v185_v42  ;;  %522 = vrot.lane.b32.xlu0 %v519_v41, %s800_s22  ;;  %v475_v10 = vld [vmem:[#allocation2 + $0x38] sm:$0xf0]  ;;  %v417_v24 = vld [vmem:[#allocation2 + $0x30] sm:$0xf0] }
 0x1c9   :  { %356 = vrot.lane.b32.xlu1 %v349_v43, %s800_s22  ;;  %193 = vst [vmem:[#allocation2 + $0x20] sm:$0xf0] %v188_v45  ;;  %v423_v26 = vrot.slane %v417_v24, 4  ;;  %v535_v28 = vld [vmem:[#allocation2 + $0x38] sm:$0xf0]  ;;  %v270_v41 = vrot.slane %v264_v39, 4 }
 0x1ca   :  { %v541_v30 = vrot.slane %v535_v28, 4  ;;  %v534_v38 = vld [vmem:[#allocation2 + $0x30] sm:$0xf0]  ;;  %v418_v43 = vld [vmem:[#allocation2 + $0x38] sm:$0xf0] }
 0x1cb   :  { %v369_v60 = vld [vmem:[#allocation2 + $0x28] sm:$0xf]  ;;  %v540_v40 = vrot.slane %v534_v38, 4  ;;  %v424_v45 = vrot.slane %v418_v43, 4 }
 0x1cc   :  { %298 = vrot.lane.b32.xlu0 %v293_v46, %s799_s1  ;;  %v368_v57 = vld [vmem:[#allocation2 + $0x20] sm:$0xf]  ;;  %v246_v22 = vld [vmem:[#allocation2 + $0x28] sm:$0xf]  ;;  %v265_v46 = vld [vmem:[#allocation2 + $0x10] sm:$0xf] }
 0x1cd   :  { %464 = vrot.lane.b32.xlu1 %v457_v47, %s799_s1  ;;  %v245_v13 = vld [vmem:[#allocation2 + $0x20] sm:$0xf]  ;;  %v309_v42 = vld [vmem:[#allocation2 + $0x28] sm:$0xf]  ;;  %v271_v47 = vrot.slane %v265_v46, 4 }
 0x1ce   :  { %v308_v35 = vld [vmem:[#allocation2 + $0x20] sm:$0xf]  ;;  %v315_v44 = vrot.slane %v309_v42, 4 }
 0x1cf   :  { %v386_v49 = vld [vmem:[#allocation2 + $0x18] sm:$0xf0]  ;;  %v314_v37 = vrot.slane %v308_v35, 4 }
 0x1d0   :  { %v390_v52 = vrot.slane %v386_v49, 4  ;;  %466 = vrot.lane.b32.xlu0 %v458_v48, %s799_s1  ;;  %v387_v53 = vld [vmem:[#allocation2 + $0x20] sm:$0xf0]  ;;  %v492_v20 = vld [vmem:[#allocation2 + $0x18] sm:$0xf0] }
 0x1d1   :  { %233 = vrot.lane.b32.xlu1 %v226_v50, %s801_s23  ;;  %v391_v55 = vrot.slane %v387_v53, 4  ;;  %v439_v16 = vld [vmem:[#allocation2 + $0x20] sm:$0xf0]  ;;  %v498_v21 = vrot.slane %v492_v20, 4  ;;  %v438_v33 = vld [vmem:[#allocation2 + $0x18] sm:$0xf0] }
 0x1d2   :  { %394 = vst [vmem:[#allocation3 + $0x48] sm:$0xf] %v390_v52  ;;  %v493_v31 = vld [vmem:[#allocation2 + $0x20] sm:$0xf0]  ;;  %v396_v49 = vld [vmem:[#allocation2 + $0x30] sm:$0xf] }
 0x1d3   :  { %395 = vst [vmem:[#allocation3 + $0x80] sm:$0xf] %v391_v55  ;;  %v499_v32 = vrot.slane %v493_v31, 4  ;;  %v225_v48 = vld [vmem:[#allocation2] sm:$0xf0]  ;;  %v402_v50 = vrot.slane %v396_v49, 4 }
 0x1d4   :  { %484 = vrot.lane.b32.xlu0 %v476_v56, %s805_s27 }
 0x1d5   :  { %294 = vrot.lane.b32.xlu1 %v291_v54, %s799_s1 }
 0x1d8   :  { %448 = vrot.lane.b32.xlu0 %v440_v58, %s806_s28 }
 0x1d9   :  { %375 = vrot.lane.b32.xlu1 %v368_v57, %s802_s24 }
 0x1dc   :  { %377 = vrot.lane.b32.xlu0 %v369_v60, %s802_s24 }
 0x1dd   :  { %337 = vrot.lane.b32.xlu1 %v330_v61, %s803_s25 }
 0x1e0   :  { %547 = vrot.lane.b32.xlu0 %v542_v63, %s802_s24 }
 0x1e1   :  { %524 = vrot.lane.b32.xlu1 %v520_v3, %s800_s22 }
 0x1e4   :  { %339 = vrot.lane.b32.xlu0 %v331_v7, %s803_s25 }
 0x1e5   :  { %296 = vrot.lane.b32.xlu1 %v292_v6, %s799_s1 }
 0x1e8   :  { %505 = vrot.lane.b32.xlu0 %v500_v9, %s803_s25 }
 0x1e9   :  { %482 = vrot.lane.b32.xlu1 %v475_v10, %s805_s27 }
 0x1ec   :  { %526 = vrot.lane.b32.xlu0 %v521_v12, %s800_s22 }
 0x1ed   :  { %252 = vrot.lane.b32.xlu1 %v245_v13, %s804_s26 }
 0x1f0   :  { %316 = vrot.lane.b32.xlu0 %v313_v15, %s805_s27 }
 0x1f1   :  { %446 = vrot.lane.b32.xlu1 %v439_v16, %s806_s28 }
 0x1f4   :  { %480 = vrot.lane.b32.xlu0 %v474_v19, %s805_s27 }
 0x1f5   :  { %407 = vrot.lane.b32.xlu1 %v403_v18, %s801_s23 }
 0x1f8   :  { %254 = vrot.lane.b32.xlu0 %v246_v22, %s804_s26 }
 0x1f9   :  { %501 = vrot.lane.b32.xlu1 %v498_v21, %s803_s25 }
 0x1fc   :  { %430 = vrot.lane.b32.xlu0 %v425_v25, %s804_s26 }
 0x1fd   :  { %426 = vrot.lane.b32.xlu1 %v423_v26, %s804_s26 }
 0x200   :  { %272 = vrot.lane.b32.xlu0 %v269_v29, %s806_s28 }
 0x201   :  { %545 = vrot.lane.b32.xlu1 %v541_v30, %s802_s24 }
 0x204   :  { %444 = vrot.lane.b32.xlu0 %v438_v33, %s806_s28 }
 0x205   :  { %503 = vrot.lane.b32.xlu1 %v499_v32, %s803_s25 }
 0x208   :  { %409 = vrot.lane.b32.xlu0 %v404_v36, %s801_s23 }
 0x209   :  { %318 = vrot.lane.b32.xlu1 %v314_v37, %s805_s27 }
 0x20c   :  { %543 = vrot.lane.b32.xlu0 %v540_v40, %s802_s24 }
 0x20d   :  { %274 = vrot.lane.b32.xlu1 %v270_v41, %s806_s28 }
 0x210   :  { %320 = vrot.lane.b32.xlu0 %v315_v44, %s805_s27 }
 0x211   :  { %428 = vrot.lane.b32.xlu1 %v424_v45, %s804_s26 }
 0x214   :  { %276 = vrot.lane.b32.xlu0 %v271_v47, %s806_s28 }
 0x215   :  { %231 = vrot.lane.b32.xlu1 %v225_v48, %s801_s23 }
 0x218   :  { %405 = vrot.lane.b32.xlu0 %v402_v50, %s801_s23 }
 0x222   :  { %v463_v51 = vpop.permute.xlu1 %462 }
 0x223   :  { %v359_v52 = vpop.permute.xlu0 %358 }
 0x227   :  { %v236_v54 = vpop.permute.xlu0 %235 }
 0x22a   :  { %v374_v53 = vpop.permute.xlu1 %373 }
 0x233   :  { %v336_v55 = vpop.permute.xlu1 %335 }
 0x236   :  { %v355_v57 = vpop.permute.xlu0 %354 }
 0x237   :  { %v251_v56 = vpop.permute.xlu1 %250 }
 0x23a   :  { %v523_v59 = vpop.permute.xlu0 %522 }
 0x23b   :  { %v357_v58 = vpop.permute.xlu1 %356 }
 0x23c   :  { %v361_v60 = vsel %vm360_vm11, %v355_v57, %v357_v58  ;;  %v362_v61 = vsel %vm360_vm11, %v357_v58, %v359_v52 }
 0x23d   :  { %365 = vst [vmem:[#allocation3 + $0x58] sm:$0xf0] %v361_v60  ;;  %366 = vst [vmem:[#allocation3 + $0x70] sm:$0xf0] %v362_v61 }
 0x23e   :  { %v299_v63 = vpop.permute.xlu0 %298 }
 0x23f   :  { %v465_v62 = vpop.permute.xlu1 %464 }
 0x240   :  { %v468_v3 = vsel %vm300_vm12, %v463_v51, %v465_v62 }
 0x241   :  { %472 = vst [vmem:[#allocation3 + $0x98] sm:$0xf] %v468_v3 }
 0x242   :  { %v467_v6 = vpop.permute.xlu0 %466 }
 0x243   :  { %v943_v4 = vpop.permute.xlu1 %233  ;;  %v469_v8 = vsel %vm300_vm12, %v465_v62, %v467_v6 }
 0x244   :  { %v239_v7 = vsel %vm237_vm13, %v943_v4, %v236_v54  ;;  %473 = vst [vmem:[#allocation3 + $0x30] sm:$0xf] %v469_v8 }
 0x245   :  { %243 = vst [vmem:[#allocation3 + $0x68] sm:$0xf0] %v239_v7 }
 0x246   :  { %v485_v10 = vpop.permute.xlu0 %484 }
 0x247   :  { %v295_v9 = vpop.permute.xlu1 %294 }
 0x24a   :  { %v449_v12 = vpop.permute.xlu0 %448 }
 0x24b   :  { %v376_v11 = vpop.permute.xlu1 %375 }
 0x24c   :  { %v380_v13 = vsel %vm379_vm14, %v374_v53, %v376_v11 }
 0x24d   :  { %384 = vst [vmem:[#allocation3 + $0x8] sm:$0xf] %v380_v13 }
 0x24e   :  { %v378_v15 = vpop.permute.xlu0 %377 }
 0x24f   :  { %v338_v14 = vpop.permute.xlu1 %337  ;;  %v381_v17 = vsel %vm379_vm14, %v376_v11, %v378_v15 }
 0x250   :  { %v342_v16 = vsel %vm341_vm15, %v336_v55, %v338_v14  ;;  %385 = vst [vmem:[#allocation3 + $0x78] sm:$0xf] %v381_v17 }
 0x251   :  { %346 = vst [vmem:[#allocation3 + $0x58] sm:$0xf] %v342_v16 }
 0x252   :  { %v548_v19 = vpop.permute.xlu0 %547 }
 0x253   :  { %v525_v18 = vpop.permute.xlu1 %524 }
 0x254   :  { %v528_v20 = vsel %vm360_vm11, %v523_v59, %v525_v18  ;;  %v572_v27 = vld [vmem:[#allocation3 + $0x8] sm:$0xf] }
 0x255   :  { %532 = vst [vmem:[#allocation3 + $0x40] sm:$0xf0] %v528_v20 }
 0x256   :  { %v340_v22 = vpop.permute.xlu0 %339 }
 0x257   :  { %v297_v21 = vpop.permute.xlu1 %296  ;;  %v343_v25 = vsel %vm341_vm15, %v338_v14, %v340_v22  ;;  %v573_v26 = vld [vmem:[#allocation3 + $0x78] sm:$0xf] }
 0x258   :  { %v301_v23 = vsel %vm300_vm12, %v295_v9, %v297_v21  ;;  %v302_v24 = vsel %vm300_vm12, %v297_v21, %v299_v63  ;;  %347 = vst [vmem:[#allocation3 + $0x70] sm:$0xf] %v343_v25  ;;  %767 = vmatprep.subr.msk.mxu0 %vm22_vm0, %v573_v26  ;;  %v568_v36 = vld [vmem:[#allocation3 + $0x58] sm:$0xff] }
 0x259   :  { %305 = vst [vmem:[#allocation3 + $0x60] sm:$0xf] %v301_v23  ;;  %306 = vst [vmem:[#allocation3 + $0x38] sm:$0xf] %v302_v24  ;;  %768 = vmatpush1.msk.msra.mxu0 %vm22_vm0, %v572_v27 }
 0x25a   :  { %v506_v29 = vpop.permute.xlu0 %505 }
 0x25b   :  { %v483_v28 = vpop.permute.xlu1 %482 }
 0x25c   :  { %v487_v30 = vsel %vm322_vm1, %v483_v28, %v485_v10 }
 0x25d   :  { %491 = vst [vmem:[#allocation3 + $0x30] sm:$0xf0] %v487_v30 }
 0x25e   :  { %v527_v32 = vpop.permute.xlu0 %526 }
 0x25f   :  { %v253_v31 = vpop.permute.xlu1 %252  ;;  %v529_v34 = vsel %vm360_vm11, %v525_v18, %v527_v32  ;;  %v569_v35 = vld [vmem:[#allocation3 + $0x70] sm:$0xff] }
 0x260   :  { %v257_v33 = vsel %vm256_vm2, %v251_v56, %v253_v31  ;;  %533 = vst [vmem:[#allocation3 + $0x88] sm:$0xf0] %v529_v34  ;;  %616 = vmatprep.subr.mxu0 %v569_v35 }
 0x261   :  { %261 = vst [vmem:[#allocation3 + $0x10] sm:$0xf] %v257_v33  ;;  %617 = vmatpush1.msra.mxu0 %v568_v36 }
 0x262   :  { %v317_v38 = vpop.permute.xlu0 %316 }
 0x263   :  { %v447_v37 = vpop.permute.xlu1 %446 }
 0x264   :  { %v451_v39 = vsel %vm278_vm3, %v447_v37, %v449_v12 }
 0x265   :  { %455 = vst [vmem:[#allocation3 + $0x20] sm:$0xf0] %v451_v39 }
 0x266   :  { %v481_v41 = vpop.permute.xlu0 %480 }
 0x267   :  { %v408_v40 = vpop.permute.xlu1 %407  ;;  %v486_v42 = vsel %vm322_vm1, %v481_v41, %v483_v28  ;;  %v557_v28 = vld [vmem:[#allocation3 + $0x68] sm:$0xff] }
 0x268   :  { %490 = vst [vmem:[#allocation3 + $0x98] sm:$0xf0] %v486_v42 }
 0x26a   :  { %v255_v44 = vpop.permute.xlu0 %254 }
 0x26b   :  { %v502_v43 = vpop.permute.xlu1 %501  ;;  %v258_v45 = vsel %vm256_vm2, %v253_v31, %v255_v44 }
 0x26c   :  { %262 = vst [vmem:[#allocation3 + $0x28] sm:$0xf] %v258_v45 }
 0x26e   :  { %v431_v47 = vpop.permute.xlu0 %430 }
 0x26f   :  { %v427_v46 = vpop.permute.xlu1 %426  ;;  %v566_v22 = vld [vmem:[#allocation3 + $0x98] sm:$0xff] }
 0x272   :  { %v273_v49 = vpop.permute.xlu0 %272 }
 0x273   :  { %v546_v48 = vpop.permute.xlu1 %545 }
 0x274   :  { %v550_v50 = vsel %vm379_vm14, %v546_v48, %v548_v19  ;;  %v567_v19 = vld [vmem:[#allocation3 + $0x30] sm:$0xff] }
 0x275   :  { %554 = vst [vmem:[#allocation3 + $0x90] sm:$0xf] %v550_v50 }
 0x276   :  { %v445_v52 = vpop.permute.xlu0 %444 }
 0x277   :  { %v504_v51 = vpop.permute.xlu1 %503  ;;  %v450_v55 = vsel %vm278_vm3, %v445_v52, %v447_v37 }
 0x278   :  { %v507_v53 = vsel %vm341_vm15, %v502_v43, %v504_v51  ;;  %v508_v54 = vsel %vm341_vm15, %v504_v51, %v506_v29  ;;  %454 = vst [vmem:[#allocation3 + $0x18] sm:$0xf0] %v450_v55  ;;  %v555_v29 = vld [vmem:[%s1018_s3] sm:$0xff] }
 0x279   :  { %511 = vst [vmem:[#allocation3 + $0x40] sm:$0xf] %v507_v53  ;;  %512 = vst [vmem:[#allocation3 + $0x88] sm:$0xf] %v508_v54 }
 0x27a   :  { %v410_v57 = vpop.permute.xlu0 %409 }
 0x27b   :  { %v319_v56 = vpop.permute.xlu1 %318  ;;  %v412_v59 = vsel %vm237_vm13, %v408_v40, %v410_v57 }
 0x27c   :  { %v323_v58 = vsel %vm322_vm1, %v317_v38, %v319_v56  ;;  %v575_v60 = vld [vmem:[#allocation3 + $0x90] sm:$0xf]  ;;  %416 = vst [vmem:[#allocation3 + $0x80] sm:$0xf0] %v412_v59 }
 0x27d   :  { %327 = vst [vmem:[#allocation3 + $0x60] sm:$0xf0] %v323_v58  ;;  %770 = vmatprep.subr.msk.mxu1 %vm22_vm0, %v575_v60 }
 0x27e   :  { %v544_v62 = vpop.permute.xlu0 %543 }
 0x27f   :  { %v275_v61 = vpop.permute.xlu1 %274  ;;  %v549_v3 = vsel %vm379_vm14, %v544_v62, %v546_v48 }
 0x280   :  { %v279_v63 = vsel %vm278_vm3, %v273_v49, %v275_v61  ;;  %553 = vst [vmem:[#allocation3 + $0x50] sm:$0xf] %v549_v3  ;;  %v571_v16 = vld [vmem:[#allocation3 + $0x88] sm:$0xff]  ;;  %v570_v17 = vld [vmem:[#allocation3 + $0x40] sm:$0xff] }
 0x281   :  { %283 = vst [vmem:[#allocation3 + $0x10] sm:$0xf0] %v279_v63 }
 0x282   :  { %v321_v7 = vpop.permute.xlu0 %320 }
 0x283   :  { %v429_v6 = vpop.permute.xlu1 %428  ;;  %v324_v10 = vsel %vm322_vm1, %v319_v56, %v321_v7  ;;  %v559_v25 = vld [vmem:[#allocation3 + $0x80] sm:$0xff] }
 0x284   :  { %v432_v8 = vsel %vm256_vm2, %v427_v46, %v429_v6  ;;  %v433_v9 = vsel %vm256_vm2, %v429_v6, %v431_v47  ;;  %328 = vst [vmem:[#allocation3 + $0x38] sm:$0xf0] %v324_v10 }
 0x285   :  { %436 = vst [vmem:[#allocation3 + $0x18] sm:$0xf] %v432_v8  ;;  %437 = vst [vmem:[#allocation3 + $0x20] sm:$0xf] %v433_v9 }
 0x286   :  { %v277_v12 = vpop.permute.xlu0 %276 }
 0x287   :  { %v232_v11 = vpop.permute.xlu1 %231  ;;  %v280_v14 = vsel %vm278_vm3, %v275_v61, %v277_v12  ;;  %v574_v15 = vld [vmem:[#allocation3 + $0x50] sm:$0xf] }
 0x288   :  { %v238_v13 = vsel %vm237_vm13, %v232_v11, %v943_v4  ;;  %284 = vst [vmem:[#allocation3 + $0x28] sm:$0xf0] %v280_v14  ;;  %771 = vmatpush1.msk.msra.mxu1 %vm22_vm0, %v574_v15  ;;  %v564_v4 = vld [vmem:[#allocation3 + $0x60] sm:$0xff]  ;;  %v560_v27 = vld [vmem:[#allocation3 + $0x10] sm:$0xff] }
 0x289   :  { %242 = vst [vmem:[#allocation3] sm:$0xf0] %v238_v13  ;;  %687 = vmatprep.subr.mxu1 %v571_v16 }
 0x28a   :  { %688 = vmatpush1.msra.mxu1 %v570_v17  ;;  %v406_v18 = vpop.permute.xlu0 %405 }
 0x28b   :  { %v411_v20 = vsel %vm237_vm13, %v406_v18, %v408_v40  ;;  %689 = vmatprep.subr.mxu1 %v567_v19  ;;  %v565_v21 = vld [vmem:[#allocation3 + $0x38] sm:$0xff] }
 0x28c   :  { %v563_v23 = vld [vmem:[#allocation3 + $0x20] sm:$0xff]  ;;  %415 = vst [vmem:[#allocation3 + $0x48] sm:$0xf0] %v411_v20  ;;  %618 = vmatprep.subr.mxu0 %v565_v21  ;;  %690 = vmatpush1.msra.mxu1 %v566_v22  ;;  %v562_v24 = vld [vmem:[#allocation3 + $0x18] sm:$0xff] }
 0x28d   :  { %619 = vmatpush1.msra.mxu0 %v564_v4  ;;  %691 = vmatprep.subr.mxu1 %v563_v23 }
 0x28e   :  { %692 = vmatpush1.msra.mxu1 %v562_v24 }
 0x28f   :  { %693 = vmatprep.subr.mxu1 %v559_v25  ;;  %v561_v26 = vld [vmem:[#allocation3 + $0x28] sm:$0xff] }
 0x290   :  { %620 = vmatprep.subr.mxu0 %v561_v26  ;;  %v556_v30 = vld [vmem:[#allocation3] sm:$0xff] }
 0x291   :  { %621 = vmatpush1.msra.mxu0 %v560_v27 }
 0x292   :  { %622 = vmatprep.subr.mxu0 %v557_v28 }
 0x293   :  { %623 = vmatpush1.msra.mxu0 %v556_v30  ;;  %v558_v31 = vld [vmem:[#allocation3 + $0x48] sm:$0xff] }
 0x294   :  { %769 = vmatmul.mubr.msk.f32.vlgmr.msra.gmra.mxu0 %vm576_vm4, %v555_v29  ;;  %694 = vmatpush1.msra.mxu1 %v558_v31 }
 0x295   :  { %772 = vmatmul.mubr.msk.f32.vlgmr.msra.gmra.mxu1 %vm576_vm4, %v555_v29 }
 0x354   :  { %v658_v32 = vpop.f32.mrf.mxu0 }
 0x355   :  { %v736_v33 = vrot.slane %v658_v32, 4  ;;  %v729_v34 = vpop.f32.mrf.mxu1 }
 0x356   :  { %v748_v35 = vrot.slane %v729_v34, 4  ;;  %v660_v36 = vpop.f32.mrf.mxu0 }
 0x357   :  { %v740_v37 = vsel %vm22_vm0, %v835_v0, %v736_v33  ;;  %744 = vst [vmem:[%s1019_s4 + $0x10] sm:$0xf] %v736_v33  ;;  %v737_v38 = vrot.slane %v660_v36, 4  ;;  %v731_v39 = vpop.f32.mrf.mxu1 }
 0x358   :  { %742 = vst [vmem:[%s1019_s4] sm:$0xff] %v740_v37  ;;  %v752_v40 = vsel %vm22_vm0, %v840_v1, %v748_v35  ;;  %775 = vst [vmem:[%s1019_s4 + $0x30] sm:$0xf] %v748_v35  ;;  %v749_v41 = vrot.slane %v731_v39, 4 }
 0x359   :  { %773 = vst [vmem:[%s1019_s4 + $0x20] sm:$0xff] %v752_v40  ;;  %v741_v0 = vsel %vm22_vm0, %v844_v2, %v737_v38  ;;  %745 = vst [vmem:[%s1019_s4 + $0x18] sm:$0xf] %v737_v38 }
 0x35a   :  { %743 = vst [vmem:[%s1019_s4 + $0x8] sm:$0xff] %v741_v0  ;;  %v753_v1 = vsel %vm22_vm0, %v852_v5, %v749_v41  ;;  %776 = vst [vmem:[%s1019_s4 + $0x38] sm:$0xf] %v749_v41 }
 0x35b   :  { %774 = vst [vmem:[%s1019_s4 + $0x28] sm:$0xff] %v753_v1 }

</bundles_post_ra>
